<compile_context>
chip_gen: v7x
topology: tpu7x:2x2x1
jax: 0.10.0
libtpu: 0.0.40
codegen_flags: <defaults>
</compile_context>

<pallas_src>
import jax
import jax.numpy as jnp
from jax import lax
from jax.experimental import pallas as pl
from jax.experimental.pallas import tpu as pltpu


def _round_up(n, m):
    return ((n + m - 1) // m) * m


def _make_channel_attention_kernel(c_valid, c_pad):
    """Kernel closure over the static (valid, padded) channel counts."""

    def kernel(beta_ref, x_ref, o_ref):
        # beta_ref: SMEM (1,) float32
        # x_ref / o_ref: VMEM blocks of shape (Cp, HWp) (batch dim squeezed away)
        x = x_ref[...]                                       # native dtype, (Cp, HWp)

        # attention = feat_a @ feat_a^T  -- contract last dims, no transpose.
        att = lax.dot_general(
            x, x,
            dimension_numbers=(((1,), (1,)), ((), ())),
            preferred_element_type=jnp.float32,
        )                                                    # (Cp, Cp) f32

        # softmax(rowmax - att) == exp(rowmin - att) / sum   (shift invariance),
        # exponents are <= 0 so this is numerically safe.
        rowmin = jnp.min(att, axis=-1, keepdims=True)
        e = jnp.exp(rowmin - att)

        if c_pad > c_valid:
            # Zero-padded channels must not contribute to the softmax denominator.
            col = lax.broadcasted_iota(jnp.int32, (c_pad, c_pad), 1)
            e = jnp.where(col < c_valid, e, 0.0)

        inv = pl.reciprocal(jnp.sum(e, axis=-1, keepdims=True), approx=True)
        beta = beta_ref[0]
        # Fold beta into the small (Cp, Cp) matrix instead of the (Cp, HWp) result.
        p = (e * (inv * beta)).astype(x.dtype)

        # feat_e = (beta * softmax) @ feat_a  -> (Cp, HWp), f32 accumulation.
        feat_e = jnp.dot(p, x, preferred_element_type=jnp.float32)

        # Residual: out = beta*feat_e + x  (beta already applied above).
        o_ref[...] = (feat_e + x.astype(jnp.float32)).astype(o_ref.dtype)

    return kernel


def channel_attention(x, beta):
    """x: (B, C, H, W); beta: scalar parameter (shape (1,) or scalar)."""
    B, C, H, W = x.shape
    HW = H * W
    Cp = _round_up(C, 8)
    HWp = _round_up(HW, 128)

    x_flat = x.reshape(B, C, HW)
    if (Cp, HWp) != (C, HW):
        x_flat = jnp.pad(x_flat, ((0, 0), (0, Cp - C), (0, HWp - HW)))
    beta = jnp.asarray(beta, jnp.float32).reshape(1)

    itemsize = jnp.dtype(x.dtype).itemsize
    # double-buffered in + out tiles, f32 feat_e temp, (Cp,Cp) f32 temporaries.
    vmem_need = 4 * Cp * HWp * itemsize + Cp * HWp * 4 + 4 * Cp * Cp * 4
    vmem_bytes = min(max(int(vmem_need * 1.3), 32 * 1024 * 1024), 64 * 1024 * 1024)

    cost = pl.CostEstimate(
        flops=4 * B * Cp * Cp * HWp,            # two matmuls
        transcendentals=B * Cp * Cp,            # exp
        bytes_accessed=2 * B * Cp * HWp * itemsize + 4,
    )

    out_flat = pl.pallas_call(
        _make_channel_attention_kernel(C, Cp),
        out_shape=jax.ShapeDtypeStruct((B, Cp, HWp), x.dtype),
        grid_spec=pltpu.PrefetchScalarGridSpec(
            num_scalar_prefetch=0,
            grid=(B,),
            in_specs=[
                pl.BlockSpec(memory_space=pltpu.MemorySpace.SMEM),        # beta
                pl.BlockSpec((None, Cp, HWp), lambda b: (b, 0, 0)),       # x (batch squeezed)
            ],
            out_specs=pl.BlockSpec((None, Cp, HWp), lambda b: (b, 0, 0)),
        ),
        compiler_params=pltpu.CompilerParams(
            dimension_semantics=("parallel",),
            vmem_limit_bytes=vmem_bytes,
        ),
        cost_estimate=cost,
    )(beta, x_flat)

    return out_flat[:, :C, :HW].reshape(B, C, H, W)


def channel_attention_ref(x, beta):
    """Pure-JAX reference mirroring the PyTorch forward."""
    B, C, H, W = x.shape
    feat_a = x.reshape(B, C, H * W).astype(jnp.float32)
    att = jnp.einsum("bcn,bdn->bcd", feat_a, feat_a)
    att_new = jnp.max(att, axis=-1, keepdims=True) - att
    att_sm = jax.nn.softmax(att_new, axis=-1)
    feat_e = jnp.einsum("bcd,bdn->bcn", att_sm, feat_a).reshape(B, C, H, W)
    return (jnp.asarray(beta, jnp.float32).reshape(()) * feat_e
            + x.astype(jnp.float32)).astype(x.dtype)


if __name__ == "__main__":
    key = jax.random.PRNGKey(0)
    B, C, H, W = 2, 4, 16, 16
    x = jax.random.normal(key, (B, C, H, W), dtype=jnp.float32)

    # Parameter init per the module is beta = zeros(1); use a nonzero beta so the
    # attention path is actually exercised, then also check the beta=0 identity.
    beta = jnp.array([0.5], dtype=jnp.float32)

    out = channel_attention(x, beta)
    jax.block_until_ready(out)

    ref = channel_attention_ref(x, beta)
    assert out.shape == (B, C, H, W)
    # Tolerance accounts for the EUP approximate reciprocal in the softmax.
    assert jnp.allclose(out, ref, atol=1e-2, rtol=1e-2), "mismatch vs reference"

    # As-initialized (beta = 0): output must equal the input exactly.
    out0 = channel_attention(x, jnp.zeros((1,), jnp.float32))
    jax.block_until_ready(out0)
    assert jnp.allclose(out0, x, atol=1e-6)

    print("KERNEL_OK")
</pallas_src>

<mosaic_0001>
module attributes {stable_mosaic.version = 11 : i64} {
  func.func @kernel(%arg0: i32, %arg1: memref<1xf32, #tpu.memory_space<smem>>, %arg2: memref<1x8x256xf32, #tpu.memory_space<vmem>>, %arg3: memref<1x8x256xf32, #tpu.memory_space<vmem>>) attributes {dimension_semantics = [#tpu.dimension_semantics<parallel>], iteration_bounds = array<i64: 2>, scalar_prefetch = 0 : i64, scratch_operands = 0 : i64, tpu.core_type = #tpu.core_type<tc>, window_params = [{transform_indices = @transform_0, window_bounds = array<i64: 1>}, {transform_indices = @transform_1, window_bounds = array<i64: 1, 8, 256>}, {transform_indices = @transform_2, window_bounds = array<i64: 1, 8, 256>}]} {
    %c0 = arith.constant 0 : index
    %c0_0 = arith.constant 0 : index
    %c0_1 = arith.constant 0 : index
    %0 = vector.load %arg2[%c0, %c0_0, %c0_1] : memref<1x8x256xf32, #tpu.memory_space<vmem>>, vector<1x8x256xf32>
    %1 = vector.shape_cast %0 : vector<1x8x256xf32> to vector<8x256xf32>
    %cst = arith.constant dense<0.000000e+00> : vector<8x8xf32>
    %2 = tpu.matmul %1, %1, %cst {dimension_numbers = #tpu.dot_dimension_numbers<[1], [1], [0], [0], [0, 0, 1, 0], [], []>} : vector<8x256xf32>, vector<8x256xf32>, vector<8x8xf32> -> vector<8x8xf32>
    %cst_2 = arith.constant dense<0x7F800000> : vector<8xf32>
    %3 = vector.multi_reduction <minimumf>, %2, %cst_2 [1] : vector<8x8xf32> to vector<8xf32>
    %4 = vector.shape_cast %3 : vector<8xf32> to vector<8x1xf32>
    %5 = vector.broadcast %4 : vector<8x1xf32> to vector<8x8xf32>
    %6 = arith.subf %5, %2 : vector<8x8xf32>
    %7 = math.exp %6 : vector<8x8xf32>
    %8 = tpu.iota {dimensions = array<i32: 1>} : vector<8x8xi32>
    %c4_i32 = arith.constant 4 : i32
    %9 = vector.broadcast %c4_i32 : i32 to vector<8x8xi32>
    %10 = arith.cmpi slt, %8, %9 : vector<8x8xi32>
    %cst_3 = arith.constant 0.000000e+00 : f32
    %11 = vector.broadcast %cst_3 : f32 to vector<8x8xf32>
    %12 = arith.select %10, %7, %11 : vector<8x8xi1>, vector<8x8xf32>
    %cst_4 = arith.constant dense<0.000000e+00> : vector<8xf32>
    %13 = vector.multi_reduction <add>, %12, %cst_4 [1] : vector<8x8xf32> to vector<8xf32>
    %14 = vector.shape_cast %13 : vector<8xf32> to vector<8x1xf32>
    %15 = tpu.reciprocal %14 {approx = true} : vector<8x1xf32> -> vector<8x1xf32>
    %c0_5 = arith.constant 0 : index
    %16 = memref.load %arg1[%c0_5] : memref<1xf32, #tpu.memory_space<smem>>
    %17 = vector.broadcast %16 : f32 to vector<8x1xf32>
    %18 = arith.mulf %15, %17 : vector<8x1xf32>
    %19 = vector.broadcast %18 : vector<8x1xf32> to vector<8x8xf32>
    %20 = arith.mulf %12, %19 : vector<8x8xf32>
    %cst_6 = arith.constant dense<0.000000e+00> : vector<8x256xf32>
    %21 = tpu.matmul %20, %1, %cst_6 {dimension_numbers = #tpu.dot_dimension_numbers<[1], [0], [0], [1], [0, 0, 1, 1], [], []>} : vector<8x8xf32>, vector<8x256xf32>, vector<8x256xf32> -> vector<8x256xf32>
    %22 = arith.addf %21, %1 : vector<8x256xf32>
    %c0_7 = arith.constant 0 : index
    %c0_8 = arith.constant 0 : index
    %c0_9 = arith.constant 0 : index
    %23 = vector.load %arg3[%c0_7, %c0_8, %c0_9] : memref<1x8x256xf32, #tpu.memory_space<vmem>>, vector<1x8x256xf32>
    %24 = vector.shape_cast %23 : vector<1x8x256xf32> to vector<8x256xf32>
    %25 = vector.shape_cast %22 : vector<8x256xf32> to vector<1x8x256xf32>
    tpu.vector_store %arg3[%c0_7, %c0_8, %c0_9], %25 {strides = array<i32>} : memref<1x8x256xf32, #tpu.memory_space<vmem>>, vector<1x8x256xf32>,
    return
  }
  func.func @transform_0(%arg0: i32) -> i32 {
    %c0_i32 = arith.constant 0 : i32
    %c0_i32_0 = arith.constant 0 : i32
    return %c0_i32 : i32
  }
  func.func @transform_1(%arg0: i32) -> (i32, i32, i32) {
    %c0_i32 = arith.constant 0 : i32
    %c0_i32_0 = arith.constant 0 : i32
    %c0_i32_1 = arith.constant 0 : i32
    return %arg0, %c0_i32, %c0_i32_0 : i32, i32, i32
  }
  func.func @transform_2(%arg0: i32) -> (i32, i32, i32) {
    %c0_i32 = arith.constant 0 : i32
    %c0_i32_0 = arith.constant 0 : i32
    %c0_i32_1 = arith.constant 0 : i32
    return %arg0, %c0_i32, %c0_i32_0 : i32, i32, i32
  }
}

</mosaic_0001>

<bundles_post_ra>
// kernel: tpu_custom_call.1
= control target key start
LH: loop header
LB: loop body
LE: loop exit
PB: predicated region body
PF: predicated region fallthrough
CT: control target
= control target key end

     0   :  { %s768_s0 = inlined_call_operand.<no memory space> [shape: f32[1], index: 0, kind: input, shape index: {}]   ;;  %s769_s1 = inlined_call_operand.hbm [shape: f32[2,8,256], index: 1, kind: input, shape index: {}]   ;;  %s770_s2 = inlined_call_operand.hbm [shape: f32[2,8,256], index: 2, kind: output, shape index: {}]  }
   0x1   :  { %7 = sst [smem:[#allocation2]] %s768_s0 }
   0x2   :  { %8 = vsyncpa [#allocation4], 0 }
   0x3   :  { %10 = vsyncpa [#allocation4 + $0x1], 0 }
   0x4   :  { %11 = vsyncpa [#allocation5], 0 }
   0x5   :  { %13 = vsyncpa [#allocation5 + $0x1], 0  ;;  %s600_s11 = smov 0   ;;  %s602_s12 = smov 0  }
   0x6   :  { %s604_s13 = smov 0   ;;  %s606_s14 = smov 0  }
   0x7 LB: > { %s621_s0 = sadd.s32 4294967295, %s577_s14   ;;  %s413_s15 = sadd.s32 4294967294, %s577_s14   ;;  %s577_s14 = sphi %s606_s14, %s785_s14   ;;  %s573_s13 = sphi %s604_s13, %s784_s13   ;;  %s569_s12 = sphi %s602_s12, %s783_s12   ;;  %s565_s11 = sphi %s600_s11, %s782_s11  }
   0x8   : > { %s625_s16 = sadd.s32 1, %s577_s14   ;;  %s47_s17 = sadd.s32 1, %s573_s13 }
   0x9   : > { %s44_s18 = ssub.s32 %s577_s14, %s625_s16  ;;  %p54_p0 = scmp.ne.s32.totalorder %s573_s13, %s569_s12 }
   0xa   : > { %p45_p1 = scmp.eq.s32.totalorder %s44_s18, 0  ;;  %p55_p2 = scmp.eq.s32.totalorder %s577_s14, 0 }
   0xb   : > { %p60_p3 = scmp.ne.s32.totalorder %s569_s12, %s565_s11  ;;  %p61_p4 = scmp.eq.s32.totalorder %s621_s0, 0 }
   0xc   : > { %s637_s19 = scalar_select %p45_p1, %s573_s13, %s47_s17  }
   0xd   : > { %p639_p5 = por %p55_p2, %p54_p0  ;;  %p643_p6 = por %p61_p4, %p60_p3 }
   0xe   : > { %p84_p7 = scmp.eq.s32.totalorder %s621_s0, 1  ;;  %p90_p8 = scmp.eq.s32.totalorder %s413_s15, 1 }
   0xf   : > { %p442_p10 = scmp.lt.s32.totalorder %s577_s14, 2  ;;  %s113_s24 = sand.u32 1, %s573_s13  }
  0x10   : > { %p650_p11 = por %p84_p7, %p54_p0  ;;  %p654_p12 = por %p90_p8, %p60_p3 }
  0x11   : > { %s428_s25 = sshll.u32 %s577_s14, 8  ;;  %s416_s26 = sshll.u32 %s113_s24, 4 }
  0x12   : > { %s774_s22 = scalar_select %p650_p11, 1, 0 }
  0x13   : > { %s775_s23 = scalar_select %p654_p12, 1, 0 }
  0x14   : > { %s663_s29 = scalar_lea.hbm %s769_s1, %s428_s25  ;;  %s117_s30 = scalar_lea.vmem [#allocation3], %s416_s26 }
  0x15   : > { %s125_s3 = sshll.u32 %s117_s30, 4  ;;  %p667_p13 = pnand %p442_p10, %p639_p5  ;;  %s671_s3 = int_to_ptr.vmem [resolvable:$true] %s125_s3 }
  0x16   : > { %s114_s5 = scalar_lea.sflag [#allocation4], %s113_s24  ;;  %s481_s6 = scalar_lea.hbm %s663_s29, 256 }
  0x17   : > { %p482_p2 = scmp.ne.s32.totalorder %s663_s29, %s481_s6  ;;  %p483_p3 = pneg %p667_p13 }
  0x18   : > { %s486_s9 = scalar_lea.hbm %s769_s1, 512  ;;  %p487_p5 = scmp.lt.u32.totalorder %s663_s29, %s769_s1 }
  0x19   : > { %p484_p4 = pnand %p483_p3, %p482_p2  ;;  %p488_p8 = scmp.lt.u32.totalorder %s486_s9, %s481_s6 }
  0x1a   : > { %p490_p9 = scmp.lt.u32.totalorder %s481_s6, %s663_s29 }
  0x1b   : > { %p485_p7 = pneg %p484_p4  ;;  %p489_p10 = por %p488_p8, %p487_p5 }
  0x1d   : > { %p491_p0 = por %p490_p9, %p489_p10 }
  0x1f   : > { %p492_p1 = pnand %p491_p0, %p485_p7 }
  0x21   : > { %495 = shalt.err (!%p492_p1)
}
  0x22   : > { %s496_s17 = scalar_lea.vmem %s671_s3, 256  ;;  %s579_s18 = smov [#allocation3]  }
  0x23   : > { %p497_p2 = scmp.ne.s32.totalorder %s671_s3, %s496_s17  ;;  %s501_s20 = sshll.u32 %s579_s18, 4  ;;  %s502_s20 = int_to_ptr.vmem [resolvable:$false] %s501_s20 }
  0x24   : > { %s503_s24 = scalar_lea.vmem %s502_s20, 512  ;;  %p504_p11 = scmp.lt.s32.totalorder %s671_s3, %s502_s20 }
  0x25   : > { %p499_p4 = pnand %p497_p2, %p483_p3  ;;  %p505_p5 = scmp.lt.s32.totalorder %s503_s24, %s496_s17 }
  0x27   : > { %p500_p12 = pneg %p499_p4  ;;  %p506_p8 = por %p505_p5, %p504_p11 }
  0x29   : > { %p507_p9 = pnand %p506_p8, %p500_p12 }
  0x2b   : > { %510 = shalt.err (!%p507_p9)
}
  0x2c   : > { %437 = dma.hbm_to_vmem [thread:$0]  (!%p667_p13), %s663_s29, 256, %s671_s3, %s114_s5  }
  0x2d   : > { %p777_p0 = scmp.lt.s32.totalorder %s577_s14, 3  ;;  %p778_p1 = scmp.ge.s32.totalorder %s577_s14, 1 }
  0x2f   : > { %p131_p3 = pnand %p778_p1, %p777_p0 }
  0x30   : > { %s705_s25 = sand.u32 (!%p131_p3), 1, %s569_s12  }
  0x31   : > { %134 = sbr.rel (%p131_p3) target bundleno = 820 (0x334), region = 28  ;;  %s420_s26 = sshll.u32 (!%p131_p3), %s705_s25, 4 }
  0x32   : > { %s137_s27 = scalar_lea.sflag (!%p131_p3), [#allocation4], %s705_s25  ;;  %s140_s28 = scalar_lea.vmem (!%p131_p3), [#allocation3], %s420_s26 }
  0x38   : > { %556 = dma.done.wait (%p643_p6), %s137_s27, 256  }
  0x39   : > { %558 = vsyncadd (%p643_p6), %s137_s27, 4294967040  ;;  %v162_v0 = vld [vmem:[%s140_s28 + $0x8] sm:$0xff]  ;;  %v161_v1 = vld [vmem:[%s140_s28] sm:$0xff]  ;;  %vm233_vm0 = vcmask 64512   ;;  %v240_v8 = vlaneseq  ;;  %v580_v13 = vmov 0.0   ;;  %s248_s21 = sld [smem:[#allocation2]] }
  0x3a   : > { %163 = vmatprep.subr.mxu0 %v162_v0  ;;  %227 = vmatprep.mubr.f32.mxu0 %v162_v0  ;;  %s429_s29 = sshll.u32 %s621_s0, 8  ;;  %s160_s30 = scalar_lea.vmem [#allocation6], %s420_s26 }
  0x3b   : > { %164 = vmatpush1.xpose.msra.mxu0 %v161_v1  ;;  %255 = vmatprep.subr.mxu1 %v162_v0  ;;  %v241_v9 = vand.u32 127, %v240_v8  ;;  %s343_s3 = sshll.u32 %s160_s30, 4  ;;  %s724_s6 = scalar_lea.hbm %s770_s2, %s429_s29  ;;  %s726_s3 = int_to_ptr.vmem [resolvable:$true] %s343_s3 }
  0x3c   : > { %256 = vmatpush1.msra.mxu1 %v161_v1  ;;  %319 = vmatprep.mubr.f32.mxu1 %v580_v13  ;;  %s329_s0 = scalar_lea.sflag [#allocation5], %s705_s25  ;;  %s511_s7 = scalar_lea.vmem %s726_s3, 256 }
  0x3d   : > { %vm242_vm1 = vcmp.lt.s32.totalorder %v241_v9, 4  ;;  %p512_p6 = scmp.ne.s32.totalorder %s726_s3, %s511_s7  ;;  %p779_p11 = scmp.ne.s32.totalorder %s774_s22, 0 }
  0x3e   : > { %228 = vmatmul.mubr.f32.vlgmr.msra.gmra.mrb[0].mxu0 %v161_v1  ;;  %s581_s8 = smov [#allocation6]  }
  0x3f   : > { %v249_v15 = vstv %s248_s21  ;;  %p513_p12 = pnand %p512_p6, %p779_p11  ;;  %s515_s9 = sshll.u32 %s581_s8, 4  ;;  %s516_s9 = int_to_ptr.vmem [resolvable:$false] %s515_s9 }
  0x40   : > { %s517_s10 = scalar_lea.vmem %s516_s9, 512  ;;  %p518_p7 = scmp.lt.s32.totalorder %s726_s3, %s516_s9 }
  0x41   : > { %p514_p13 = pneg %p513_p12  ;;  %p519_p10 = scmp.lt.s32.totalorder %s517_s10, %s511_s7 }
  0x43   : > { %p520_p2 = por %p519_p10, %p518_p7 }
  0x45   : > { %p521_p4 = pnand %p520_p2, %p514_p13 }
 0x111   : > { %v229_v2 = vpop.f32.mrb[0].mxu0 }
 0x112   : > { %v231_v3 = vpop.f32.mrb[1].mxu0  ;;  %v234_v4 = vsel %vm233_vm0, %v229_v2, inf }
 0x113   : > { %235 = vmin.xlane.f32.xlu0 %v234_v4 }
 0x1a0   : > { %v236_v5 = vpop.xlane.xlu0 %235 }
 0x1a1   : > { %v237_v6 = vsub.f32 %v236_v5, %v229_v2 }
 0x1a3   : > { %v238_v7 = vmul.f32 1.442695, %v237_v6 }
 0x1a5   : > { %477 = vpow2.f32 %v238_v7 }
 0x1af   : > { %v478_v10 = vpop.eup %477 }
 0x1b0   : > { %v243_v11 = vsel %vm242_vm1, %v478_v10, 0.0 }
 0x1b1   : > { %v244_v12 = vsel %vm233_vm0, %v243_v11, 0.0 }
 0x1b2   : > { %245 = vadd.xlane.f32.xlu0 %v244_v12 }
 0x23f   : > { %v246_v14 = vpop.xlane.xlu0 %245 }
 0x240   : > { %479 = vrcp.f32 %v246_v14 }
 0x24a   : > { %v480_v16 = vpop.eup %479 }
 0x24b   : > { %v250_v17 = vmul.f32 %v480_v16, %v249_v15 }
 0x24d   : > { %v251_v18 = vmul.f32 %v250_v17, %v243_v11 }
 0x24f   : > { %422 = vmatmul.mubr.msk.f32.vlgmr.msra.gmra.mrb[0].mxu1 %vm233_vm0, %v251_v18 }
 0x322   : > { %v321_v19 = vpop.f32.mrb[0].mxu1 }
 0x323   : > { %v322_v20 = vadd.f32 %v321_v19, %v161_v1  ;;  %v323_v21 = vpop.f32.mrb[1].mxu1 }
 0x324   : > { %v324_v22 = vadd.f32 %v323_v21, %v162_v0 }
 0x325   : > { %326 = vst [vmem:[%s160_s30] sm:$0xff] %v322_v20 }
 0x326   : > { %327 = vst [vmem:[%s160_s30 + $0x8] sm:$0xff] %v324_v22 }
 0x327   : > { %524 = shalt.err (!%p521_p4)
}
 0x328   : > { %s525_s15 = scalar_lea.hbm %s724_s6, 256  ;;  %s529_s20 = scalar_lea.hbm %s770_s2, 512 }
 0x329   : > { %p526_p5 = scmp.ne.s32.totalorder %s724_s6, %s525_s15  ;;  %p530_p0 = scmp.lt.u32.totalorder %s724_s6, %s770_s2 }
 0x32a   : > { %p531_p1 = scmp.lt.u32.totalorder %s529_s20, %s525_s15  ;;  %p533_p6 = scmp.lt.u32.totalorder %s525_s15, %s724_s6 }
 0x32b   : > { %p527_p8 = pnand %p526_p5, %p779_p11 }
 0x32c   : > { %p532_p3 = por %p531_p1, %p530_p0 }
 0x32d   : > { %p528_p9 = pneg %p527_p8 }
 0x32e   : > { %p534_p12 = por %p533_p6, %p532_p3 }
 0x330   : > { %p535_p13 = pnand %p534_p12, %p528_p9 }
 0x332   : > { %538 = shalt.err (!%p535_p13)
}
 0x333   : > { %432 = dma.vmem_to_hbm [thread:$0]  (%p779_p11), %s726_s3, 256, %s724_s6, %s329_s0  }
 0x334 PF: > { %s355_s26 = sand.u32 1, %s565_s11   ;;  %p780_p7 = scmp.ne.s32.totalorder %s775_s23, 0 }
 0x335   : > { %p781_p10 = scmp.ge.s32.totalorder %s577_s14, 2  ;;  %s356_s27 = scalar_lea.sflag [#allocation5], %s355_s26 }
 0x337   : > { %p439_p2 = pnand %p781_p10, %p780_p7 }
 0x339   : > { %560 = dma.done.wait (!%p439_p2), %s356_s27, 256  }
 0x33a   : > { %562 = vsyncadd (!%p439_p2), %s356_s27, 4294967040  ;;  %p16_p4 = scmp.ge.s32.totalorder %s625_s16, 4   ;;  %s782_s11 = smov %s569_s12 }
 0x33b   : > { %s783_s12 = smov %s573_s13  ;;  %s784_s13 = smov %s637_s19 }
 0x33c   : > { %s785_s14 = smov %s625_s16  ;;  %18 = sbr.rel (!%p16_p4) target bundleno = 7 (0x7), region = 73 }
 0x343   :  { %361 = vsyncpa [#allocation4], 1 }
 0x344   :  { %363 = vsyncpa [#allocation4 + $0x1], 1 }
 0x345   :  { %364 = vsyncpa [#allocation5], 1 }
 0x346   :  { %366 = vsyncpa [#allocation5 + $0x1], 1 }

</bundles_post_ra>
